<compile_context>
chip_gen: v5e
topology: v5e:2x2
jax: 0.10.0
libtpu: 0.0.40
codegen_flags: <defaults>
</compile_context>

<pallas_src>
import jax
import jax.numpy as jnp
from jax.experimental import pallas as pl
from jax.experimental.pallas import tpu as pltpu


# -------------------- config (consistent with the module) --------------------
DATA_DIM = 4
HID_DIM = 32
MLP_DIM = 32
NOISE_DIM = 8
BATCH = 8  # one full f32 sublane group (perf feedback: keep rows a multiple of 8)


# -------------------- numerics helpers (safe in-kernel lowering) -------------
def _softplus(x):
    # numerically stable softplus, matches torch.nn.Softplus (beta=1)
    return jnp.log(1.0 + jnp.exp(-jnp.abs(x))) + jnp.maximum(x, 0.0)


# -------------------- single fused Pallas kernel ------------------------------
def cvae_forward_kernel(
    x_ref, h_ref, eps_ref,
    w1x_ref, w1h_ref, b1_ref,
    w21_ref, b21_ref, w22_ref, b22_ref,
    w3z_ref, w3h_ref, b3_ref,
    w4_ref, b4_ref,
    recon_ref, mu_ref, logvar_ref,
):
    x = x_ref[...]      # (B, D)
    h = h_ref[...]      # (B, H)
    eps = eps_ref[...]  # (B, Z)

    # encode: softplus(fc1(cat(x, h))) — concat eliminated by splitting fc1
    e1 = _softplus(
        jnp.dot(x, w1x_ref[...], preferred_element_type=jnp.float32)
        + jnp.dot(h, w1h_ref[...], preferred_element_type=jnp.float32)
        + b1_ref[...]
    )
    mu = jnp.dot(e1, w21_ref[...], preferred_element_type=jnp.float32) + b21_ref[...]
    logvar = jnp.dot(e1, w22_ref[...], preferred_element_type=jnp.float32) + b22_ref[...]

    # reparameterize: z = eps * exp(0.5 * logvar) + mu
    z = eps * jnp.exp(0.5 * logvar) + mu

    # decode: softplus(fc3(cat(z, h))) — concat eliminated by splitting fc3
    d1 = _softplus(
        jnp.dot(z, w3z_ref[...], preferred_element_type=jnp.float32)
        + jnp.dot(h, w3h_ref[...], preferred_element_type=jnp.float32)
        + b3_ref[...]
    )
    # recon = cat(relu(fc41(d1)), fc42(d1)): fc41/fc42 fused into one (MLP, D)
    # matmul; ReLU only on column 0 via an iota mask (no lane concat).
    r = jnp.dot(d1, w4_ref[...], preferred_element_type=jnp.float32) + b4_ref[...]
    col = jax.lax.broadcasted_iota(jnp.int32, r.shape, 1)
    recon_ref[...] = jnp.where(col == 0, jnp.maximum(r, 0.0), r)
    mu_ref[...] = mu
    logvar_ref[...] = logvar


def cvae_forward(x, h, eps, params):
    x = x.reshape(-1, DATA_DIM)          # mirrors x.view(-1, data_dim)
    eps = eps.reshape(-1, NOISE_DIM)     # mirrors z.view(-1, noise_dim)
    B = x.shape[0]
    vmem = pl.BlockSpec(memory_space=pltpu.MemorySpace.VMEM)
    args = (
        x, h, eps,
        params["w1x"], params["w1h"], params["b1"],
        params["w21"], params["b21"], params["w22"], params["b22"],
        params["w3z"], params["w3h"], params["b3"],
        params["w4"], params["b4"],
    )
    return pl.pallas_call(
        cvae_forward_kernel,
        out_shape=(
            jax.ShapeDtypeStruct((B, DATA_DIM), jnp.float32),
            jax.ShapeDtypeStruct((B, NOISE_DIM), jnp.float32),
            jax.ShapeDtypeStruct((B, NOISE_DIM), jnp.float32),
        ),
        in_specs=[vmem] * len(args),
        out_specs=(vmem, vmem, vmem),
    )(*args)


# -------------------- pure-JAX reference (correctness guard) ------------------
def cvae_forward_ref(x, h, eps, params):
    x = x.reshape(-1, DATA_DIM)
    eps = eps.reshape(-1, NOISE_DIM)
    w1 = jnp.concatenate([params["w1x"], params["w1h"]], axis=0)
    e1 = _softplus(x @ w1[:DATA_DIM] + h @ w1[DATA_DIM:] + params["b1"])
    mu = e1 @ params["w21"] + params["b21"]
    logvar = e1 @ params["w22"] + params["b22"]
    z = eps * jnp.exp(0.5 * logvar) + mu
    w3 = jnp.concatenate([params["w3z"], params["w3h"]], axis=0)
    d1 = _softplus(z @ w3[:NOISE_DIM] + h @ w3[NOISE_DIM:] + params["b3"])
    r = d1 @ params["w4"] + params["b4"]
    recon = jnp.concatenate([jnp.maximum(r[:, :1], 0.0), r[:, 1:]], axis=-1)
    return recon, mu, logvar


# -------------------- deterministic parameter initialization ------------------
def init_params(key):
    D, H, MLP, Z = DATA_DIM, HID_DIM, MLP_DIM, NOISE_DIM
    ks = jax.random.split(key, 11)

    def w(k, in_f, out_f, scale=0.1):
        return jax.random.normal(k, (in_f, out_f), jnp.float32) * scale

    def b(k, out_f, scale=0.1):
        return jax.random.normal(k, (1, out_f), jnp.float32) * scale

    # fc1: Linear(D+H, MLP), stored pre-split along the input axis
    w1 = w(ks[0], D + H, MLP)
    # fc3: Linear(Z+H, MLP), stored pre-split along the input axis
    w3 = w(ks[5], Z + H, MLP)
    # fc41: Linear(MLP, 1) and fc42: Linear(MLP, D-1), fused into one (MLP, D)
    w41, b41 = w(ks[7], MLP, 1), b(ks[8], 1)
    w42, b42 = w(ks[9], MLP, D - 1), b(ks[10], D - 1)

    return {
        "w1x": w1[:D], "w1h": w1[D:], "b1": b(ks[1], MLP),
        "w21": w(ks[2], MLP, Z), "b21": b(ks[3], Z),
        # fc22: xavier_uniform weight, bias filled with 0.1 (init_weights)
        "w22": jax.random.uniform(ks[4], (MLP, Z), jnp.float32, -1.0, 1.0)
               * jnp.sqrt(6.0 / (MLP + Z)),
        "b22": jnp.full((1, Z), 0.1, jnp.float32),
        "w3z": w3[:Z], "w3h": w3[Z:], "b3": b(ks[6], MLP),
        "w4": jnp.concatenate([w41, w42], axis=1),
        "b4": jnp.concatenate([b41, b42], axis=1),
    }


# -------------------- main -----------------------------------------------------
if __name__ == "__main__":
    key = jax.random.PRNGKey(0)
    k_param, k_x, k_h, k_eps = jax.random.split(key, 4)

    params = init_params(k_param)
    x = jax.random.normal(k_x, (BATCH, DATA_DIM), jnp.float32)
    h = jax.random.normal(k_h, (BATCH, HID_DIM), jnp.float32)
    eps = jax.random.normal(k_eps, (BATCH, NOISE_DIM), jnp.float32)

    recon, mu, logvar = jax.jit(cvae_forward)(x, h, eps, params)
    jax.block_until_ready((recon, mu, logvar))

    # shape / finiteness checks
    assert recon.shape == (BATCH, DATA_DIM)
    assert mu.shape == (BATCH, NOISE_DIM)
    assert logvar.shape == (BATCH, NOISE_DIM)
    assert bool(jnp.isfinite(recon).all())
    assert bool(jnp.isfinite(mu).all())
    assert bool(jnp.isfinite(logvar).all())

    # numerical check against the pure-JAX reference
    r_ref, m_ref, lv_ref = cvae_forward_ref(x, h, eps, params)
    assert bool(jnp.allclose(recon, r_ref, atol=1e-4, rtol=1e-4))
    assert bool(jnp.allclose(mu, m_ref, atol=1e-4, rtol=1e-4))
    assert bool(jnp.allclose(logvar, lv_ref, atol=1e-4, rtol=1e-4))

    print("KERNEL_OK")
</pallas_src>

<mosaic_0001>
module attributes {stable_mosaic.version = 11 : i64} {
  func.func @cvae_forward_kernel(%arg0: memref<8x4xf32, #tpu.memory_space<vmem>>, %arg1: memref<8x32xf32, #tpu.memory_space<vmem>>, %arg2: memref<8x8xf32, #tpu.memory_space<vmem>>, %arg3: memref<4x32xf32, #tpu.memory_space<vmem>>, %arg4: memref<32x32xf32, #tpu.memory_space<vmem>>, %arg5: memref<1x32xf32, #tpu.memory_space<vmem>>, %arg6: memref<32x8xf32, #tpu.memory_space<vmem>>, %arg7: memref<1x8xf32, #tpu.memory_space<vmem>>, %arg8: memref<32x8xf32, #tpu.memory_space<vmem>>, %arg9: memref<1x8xf32, #tpu.memory_space<vmem>>, %arg10: memref<8x32xf32, #tpu.memory_space<vmem>>, %arg11: memref<32x32xf32, #tpu.memory_space<vmem>>, %arg12: memref<1x32xf32, #tpu.memory_space<vmem>>, %arg13: memref<32x4xf32, #tpu.memory_space<vmem>>, %arg14: memref<1x4xf32, #tpu.memory_space<vmem>>, %arg15: memref<8x4xf32, #tpu.memory_space<vmem>>, %arg16: memref<8x8xf32, #tpu.memory_space<vmem>>, %arg17: memref<8x8xf32, #tpu.memory_space<vmem>>) attributes {dimension_semantics = [], scalar_prefetch = 0 : i64, scratch_operands = 0 : i64, tpu.core_type = #tpu.core_type<tc>} {
    %c0 = arith.constant 0 : index
    %c0_0 = arith.constant 0 : index
    %0 = vector.load %arg0[%c0, %c0_0] : memref<8x4xf32, #tpu.memory_space<vmem>>, vector<8x4xf32>
    %c0_1 = arith.constant 0 : index
    %c0_2 = arith.constant 0 : index
    %1 = vector.load %arg1[%c0_1, %c0_2] : memref<8x32xf32, #tpu.memory_space<vmem>>, vector<8x32xf32>
    %c0_3 = arith.constant 0 : index
    %c0_4 = arith.constant 0 : index
    %2 = vector.load %arg2[%c0_3, %c0_4] : memref<8x8xf32, #tpu.memory_space<vmem>>, vector<8x8xf32>
    %c0_5 = arith.constant 0 : index
    %c0_6 = arith.constant 0 : index
    %3 = vector.load %arg3[%c0_5, %c0_6] : memref<4x32xf32, #tpu.memory_space<vmem>>, vector<4x32xf32>
    %cst = arith.constant dense<0.000000e+00> : vector<8x32xf32>
    %4 = tpu.matmul %0, %3, %cst {dimension_numbers = #tpu.dot_dimension_numbers<[1], [0], [0], [1], [0, 0, 1, 1], [], []>} : vector<8x4xf32>, vector<4x32xf32>, vector<8x32xf32> -> vector<8x32xf32>
    %c0_7 = arith.constant 0 : index
    %c0_8 = arith.constant 0 : index
    %5 = vector.load %arg4[%c0_7, %c0_8] : memref<32x32xf32, #tpu.memory_space<vmem>>, vector<32x32xf32>
    %cst_9 = arith.constant dense<0.000000e+00> : vector<8x32xf32>
    %6 = tpu.matmul %1, %5, %cst_9 {dimension_numbers = #tpu.dot_dimension_numbers<[1], [0], [0], [1], [0, 0, 1, 1], [], []>} : vector<8x32xf32>, vector<32x32xf32>, vector<8x32xf32> -> vector<8x32xf32>
    %7 = arith.addf %4, %6 : vector<8x32xf32>
    %c0_10 = arith.constant 0 : index
    %c0_11 = arith.constant 0 : index
    %8 = vector.load %arg5[%c0_10, %c0_11] : memref<1x32xf32, #tpu.memory_space<vmem>>, vector<1x32xf32>
    %9 = vector.broadcast %8 : vector<1x32xf32> to vector<8x32xf32>
    %10 = arith.addf %7, %9 : vector<8x32xf32>
    %11 = math.absf %10 : vector<8x32xf32>
    %cst_12 = arith.constant 0.000000e+00 : f32
    %12 = vector.broadcast %cst_12 : f32 to vector<8x32xf32>
    %13 = arith.subf %12, %11 : vector<8x32xf32>
    %14 = math.exp %13 : vector<8x32xf32>
    %cst_13 = arith.constant 1.000000e+00 : f32
    %15 = vector.broadcast %cst_13 : f32 to vector<8x32xf32>
    %16 = arith.addf %15, %14 : vector<8x32xf32>
    %17 = math.log %16 : vector<8x32xf32>
    %cst_14 = arith.constant 0.000000e+00 : f32
    %18 = vector.broadcast %cst_14 : f32 to vector<8x32xf32>
    %19 = arith.maximumf %10, %18 : vector<8x32xf32>
    %20 = arith.addf %17, %19 : vector<8x32xf32>
    %c0_15 = arith.constant 0 : index
    %c0_16 = arith.constant 0 : index
    %21 = vector.load %arg6[%c0_15, %c0_16] : memref<32x8xf32, #tpu.memory_space<vmem>>, vector<32x8xf32>
    %cst_17 = arith.constant dense<0.000000e+00> : vector<8x8xf32>
    %22 = tpu.matmul %20, %21, %cst_17 {dimension_numbers = #tpu.dot_dimension_numbers<[1], [0], [0], [1], [0, 0, 1, 1], [], []>} : vector<8x32xf32>, vector<32x8xf32>, vector<8x8xf32> -> vector<8x8xf32>
    %c0_18 = arith.constant 0 : index
    %c0_19 = arith.constant 0 : index
    %23 = vector.load %arg7[%c0_18, %c0_19] : memref<1x8xf32, #tpu.memory_space<vmem>>, vector<1x8xf32>
    %24 = vector.broadcast %23 : vector<1x8xf32> to vector<8x8xf32>
    %25 = arith.addf %22, %24 : vector<8x8xf32>
    %c0_20 = arith.constant 0 : index
    %c0_21 = arith.constant 0 : index
    %26 = vector.load %arg8[%c0_20, %c0_21] : memref<32x8xf32, #tpu.memory_space<vmem>>, vector<32x8xf32>
    %cst_22 = arith.constant dense<0.000000e+00> : vector<8x8xf32>
    %27 = tpu.matmul %20, %26, %cst_22 {dimension_numbers = #tpu.dot_dimension_numbers<[1], [0], [0], [1], [0, 0, 1, 1], [], []>} : vector<8x32xf32>, vector<32x8xf32>, vector<8x8xf32> -> vector<8x8xf32>
    %c0_23 = arith.constant 0 : index
    %c0_24 = arith.constant 0 : index
    %28 = vector.load %arg9[%c0_23, %c0_24] : memref<1x8xf32, #tpu.memory_space<vmem>>, vector<1x8xf32>
    %29 = vector.broadcast %28 : vector<1x8xf32> to vector<8x8xf32>
    %30 = arith.addf %27, %29 : vector<8x8xf32>
    %cst_25 = arith.constant 5.000000e-01 : f32
    %31 = vector.broadcast %cst_25 : f32 to vector<8x8xf32>
    %32 = arith.mulf %31, %30 : vector<8x8xf32>
    %33 = math.exp %32 : vector<8x8xf32>
    %34 = arith.mulf %2, %33 : vector<8x8xf32>
    %35 = arith.addf %34, %25 : vector<8x8xf32>
    %c0_26 = arith.constant 0 : index
    %c0_27 = arith.constant 0 : index
    %36 = vector.load %arg10[%c0_26, %c0_27] : memref<8x32xf32, #tpu.memory_space<vmem>>, vector<8x32xf32>
    %cst_28 = arith.constant dense<0.000000e+00> : vector<8x32xf32>
    %37 = tpu.matmul %35, %36, %cst_28 {dimension_numbers = #tpu.dot_dimension_numbers<[1], [0], [0], [1], [0, 0, 1, 1], [], []>} : vector<8x8xf32>, vector<8x32xf32>, vector<8x32xf32> -> vector<8x32xf32>
    %c0_29 = arith.constant 0 : index
    %c0_30 = arith.constant 0 : index
    %38 = vector.load %arg11[%c0_29, %c0_30] : memref<32x32xf32, #tpu.memory_space<vmem>>, vector<32x32xf32>
    %cst_31 = arith.constant dense<0.000000e+00> : vector<8x32xf32>
    %39 = tpu.matmul %1, %38, %cst_31 {dimension_numbers = #tpu.dot_dimension_numbers<[1], [0], [0], [1], [0, 0, 1, 1], [], []>} : vector<8x32xf32>, vector<32x32xf32>, vector<8x32xf32> -> vector<8x32xf32>
    %40 = arith.addf %37, %39 : vector<8x32xf32>
    %c0_32 = arith.constant 0 : index
    %c0_33 = arith.constant 0 : index
    %41 = vector.load %arg12[%c0_32, %c0_33] : memref<1x32xf32, #tpu.memory_space<vmem>>, vector<1x32xf32>
    %42 = vector.broadcast %41 : vector<1x32xf32> to vector<8x32xf32>
    %43 = arith.addf %40, %42 : vector<8x32xf32>
    %44 = math.absf %43 : vector<8x32xf32>
    %cst_34 = arith.constant 0.000000e+00 : f32
    %45 = vector.broadcast %cst_34 : f32 to vector<8x32xf32>
    %46 = arith.subf %45, %44 : vector<8x32xf32>
    %47 = math.exp %46 : vector<8x32xf32>
    %cst_35 = arith.constant 1.000000e+00 : f32
    %48 = vector.broadcast %cst_35 : f32 to vector<8x32xf32>
    %49 = arith.addf %48, %47 : vector<8x32xf32>
    %50 = math.log %49 : vector<8x32xf32>
    %cst_36 = arith.constant 0.000000e+00 : f32
    %51 = vector.broadcast %cst_36 : f32 to vector<8x32xf32>
    %52 = arith.maximumf %43, %51 : vector<8x32xf32>
    %53 = arith.addf %50, %52 : vector<8x32xf32>
    %c0_37 = arith.constant 0 : index
    %c0_38 = arith.constant 0 : index
    %54 = vector.load %arg13[%c0_37, %c0_38] : memref<32x4xf32, #tpu.memory_space<vmem>>, vector<32x4xf32>
    %cst_39 = arith.constant dense<0.000000e+00> : vector<8x4xf32>
    %55 = tpu.matmul %53, %54, %cst_39 {dimension_numbers = #tpu.dot_dimension_numbers<[1], [0], [0], [1], [0, 0, 1, 1], [], []>} : vector<8x32xf32>, vector<32x4xf32>, vector<8x4xf32> -> vector<8x4xf32>
    %c0_40 = arith.constant 0 : index
    %c0_41 = arith.constant 0 : index
    %56 = vector.load %arg14[%c0_40, %c0_41] : memref<1x4xf32, #tpu.memory_space<vmem>>, vector<1x4xf32>
    %57 = vector.broadcast %56 : vector<1x4xf32> to vector<8x4xf32>
    %58 = arith.addf %55, %57 : vector<8x4xf32>
    %59 = tpu.iota {dimensions = array<i32: 1>} : vector<8x4xi32>
    %c0_i32 = arith.constant 0 : i32
    %60 = vector.broadcast %c0_i32 : i32 to vector<8x4xi32>
    %61 = arith.cmpi eq, %59, %60 : vector<8x4xi32>
    %cst_42 = arith.constant 0.000000e+00 : f32
    %62 = vector.broadcast %cst_42 : f32 to vector<8x4xf32>
    %63 = arith.maximumf %58, %62 : vector<8x4xf32>
    %64 = arith.select %61, %63, %58 : vector<8x4xi1>, vector<8x4xf32>
    %c0_43 = arith.constant 0 : index
    %c0_44 = arith.constant 0 : index
    %65 = vector.load %arg15[%c0_43, %c0_44] : memref<8x4xf32, #tpu.memory_space<vmem>>, vector<8x4xf32>
    tpu.vector_store %arg15[%c0_43, %c0_44], %64 {strides = array<i32>} : memref<8x4xf32, #tpu.memory_space<vmem>>, vector<8x4xf32>,
    %c0_45 = arith.constant 0 : index
    %c0_46 = arith.constant 0 : index
    %66 = vector.load %arg16[%c0_45, %c0_46] : memref<8x8xf32, #tpu.memory_space<vmem>>, vector<8x8xf32>
    tpu.vector_store %arg16[%c0_45, %c0_46], %25 {strides = array<i32>} : memref<8x8xf32, #tpu.memory_space<vmem>>, vector<8x8xf32>,
    %c0_47 = arith.constant 0 : index
    %c0_48 = arith.constant 0 : index
    %67 = vector.load %arg17[%c0_47, %c0_48] : memref<8x8xf32, #tpu.memory_space<vmem>>, vector<8x8xf32>
    tpu.vector_store %arg17[%c0_47, %c0_48], %30 {strides = array<i32>} : memref<8x8xf32, #tpu.memory_space<vmem>>, vector<8x8xf32>,
    return
  }
}

</mosaic_0001>

<bundles_post_ra>
// kernel: cvae_forward.1
= control target key start
LH: loop header
LB: loop body
LE: loop exit
PB: predicated region body
PF: predicated region fallthrough
CT: control target
= control target key end

     0   :  { %s606_s0 = inlined_call_operand.vmem [shape: f32[8,4], index: 0, kind: input, shape index: {}]   ;;  %s607_s1 = inlined_call_operand.vmem [shape: f32[8,32], index: 1, kind: input, shape index: {}]   ;;  %s608_s2 = inlined_call_operand.vmem [shape: f32[8,8], index: 2, kind: input, shape index: {}]   ;;  %s609_s3 = inlined_call_operand.vmem [shape: f32[4,32], index: 3, kind: input, shape index: {}]   ;;  %s610_s4 = inlined_call_operand.vmem [shape: f32[32,32], index: 4, kind: input, shape index: {}]   ;;  %s611_s5 = inlined_call_operand.vmem [shape: f32[1,32], index: 5, kind: input, shape index: {}]   ;;  %s612_s6 = inlined_call_operand.vmem [shape: f32[32,8], index: 6, kind: input, shape index: {}]   ;;  %s613_s7 = inlined_call_operand.vmem [shape: f32[1,8], index: 7, kind: input, shape index: {}]   ;;  %s614_s8 = inlined_call_operand.vmem [shape: f32[32,8], index: 8, kind: input, shape index: {}]   ;;  %s615_s9 = inlined_call_operand.vmem [shape: f32[1,8], index: 9, kind: input, shape index: {}]   ;;  %s616_s10 = inlined_call_operand.vmem [shape: f32[8,32], index: 10, kind: input, shape index: {}]   ;;  %s617_s11 = inlined_call_operand.vmem [shape: f32[32,32], index: 11, kind: input, shape index: {}]   ;;  %s618_s12 = inlined_call_operand.vmem [shape: f32[1,32], index: 12, kind: input, shape index: {}]   ;;  %s619_s13 = inlined_call_operand.vmem [shape: f32[32,4], index: 13, kind: input, shape index: {}]   ;;  %s620_s14 = inlined_call_operand.vmem [shape: f32[1,4], index: 14, kind: input, shape index: {}]   ;;  %s621_s15 = inlined_call_operand.vmem [shape: f32[8,4], index: 15, kind: output, shape index: {0}]   ;;  %s622_s16 = inlined_call_operand.hbm [shape: f32[8,8], index: 16, kind: output, shape index: {1}]   ;;  %s623_s17 = inlined_call_operand.hbm [shape: f32[8,8], index: 17, kind: output, shape index: {2}]  }
   0x1   :  { %624 = sst [smem:[#allocation8_spill]] %s606_s0 }
   0x2   :  { %625 = sst [smem:[#allocation9_spill]] %s607_s1 }
   0x3   :  { %23 = vsyncpa [#allocation3], 0  ;;  %v62_v0 = vld [vmem:[%s610_s4 + $0x18] sm:$0xff]  ;;  %v61_v1 = vld [vmem:[%s610_s4 + $0x10] sm:$0xff]  ;;  %vm91_vm0 = vcmask 1043456   ;;  %vm87_vm1 = vcmask 31744  }
   0x4   :  { %79 = vmatpush.msra.mxu0 %v62_v0  ;;  %v60_v2 = vld [vmem:[%s610_s4 + $0x8] sm:$0xff]  ;;  %v58_v3 = vld [vmem:[%s609_s3] sm:$0xf]  ;;  %s626_s1 = sld [smem:[#allocation8_spill]] }
   0x5   :  { %332 = vmatpush.msk.msra.mxu1 %vm91_vm0, %v58_v3  ;;  %v59_v5 = vld [vmem:[%s610_s4] sm:$0xff] }
   0x6   :  { %80 = vmatpush.msra.mxu0 %v61_v1 }
   0xa   :  { %v55_v4 = vld [vmem:[%s626_s1] sm:$0xff] }
   0xb   :  { %333 = vmatmul.msk.f32.vlgmr.msra.gmra.mxu1 %vm87_vm1, %v55_v4 }
   0xc   :  { %24 = vsyncpa [#allocation5], 0  ;;  %81 = vmatpush.msra.mxu0 %v60_v2  ;;  %s627_s24 = sld [smem:[#allocation9_spill]]  ;;  %vm63_vm2 = vcmask 261120   ;;  %v132_v7 = vld [vmem:[%s612_s6 + $0x18] sm:$0xff]  ;;  %v131_v9 = vld [vmem:[%s612_s6 + $0x10] sm:$0xff]  ;;  %v287_v0 = vlaneseq }
   0xd   :  { %v163_v8 = vld [vmem:[%s614_s8 + $0x18] sm:$0xff]  ;;  %152 = vmatpush.msra.mxu2 %v132_v7  ;;  %v162_v10 = vld [vmem:[%s614_s8 + $0x10] sm:$0xff]  ;;  %v130_v11 = vld [vmem:[%s612_s6 + $0x8] sm:$0xff]  ;;  %vm218_vm3 = vcmask 64512   ;;  %s304_s25 = sshll.u32 %s622_s16, 4  ;;  %s409_s26 = smov [#allocation4]   ;;  %s305_s25 = int_to_ptr.hbm [resolvable:$true] %s304_s25 }
   0xe   :  { %82 = vmatpush.msra.mxu0 %v59_v5  ;;  %180 = vmatpush.msra.mxu3 %v163_v8  ;;  %v161_v12 = vld [vmem:[%s614_s8 + $0x8] sm:$0xff]  ;;  %v129_v13 = vld [vmem:[%s612_s6] sm:$0xff]  ;;  %v197_v29 = vld [vmem:[%s617_s11 + $0x18] sm:$0xff]  ;;  %s313_s27 = sshll.u32 %s409_s26, 4  ;;  %s315_s29 = sshll.u32 %s623_s17, 4  ;;  %v288_v2 = vand.u32 127, %v287_v0  ;;  %s314_s27 = int_to_ptr.vmem [resolvable:$true] %s313_s27  ;;  %s316_s29 = int_to_ptr.hbm [resolvable:$true] %s315_s29 }
   0xf   :  { %153 = vmatpush.msra.mxu2 %v131_v9  ;;  %v160_v14 = vld [vmem:[%s614_s8] sm:$0xff]  ;;  %v196_v31 = vld [vmem:[%s617_s11 + $0x10] sm:$0xff]  ;;  %210 = vmatpush.msrb.mxu1 %v197_v29  ;;  %v195_v32 = vld [vmem:[%s617_s11 + $0x8] sm:$0xff] }
  0x10   :  { %181 = vmatpush.msra.mxu3 %v162_v10  ;;  %v341_v16 = vld [vmem:[%s611_s5] ss:$0 sm:$0xff]  ;;  %v259_v46 = vld [vmem:[%s619_s13 + $0x18] sm:$0xff]  ;;  %v258_v47 = vld [vmem:[%s619_s13 + $0x10] sm:$0xff]  ;;  %vm289_vm4 = vcmp.eq.s32.totalorder %v288_v2, 0 }
  0x11   :  { %154 = vmatpush.msra.mxu2 %v130_v11  ;;  %v193_v30 = vld [vmem:[%s616_s10] sm:$0xff]  ;;  %211 = vmatpush.msrb.mxu1 %v196_v31  ;;  %v257_v48 = vld [vmem:[%s619_s13 + $0x8] sm:$0xff] }
  0x12   :  { %v56_v6 = vld [vmem:[%s627_s24] sm:$0xff]  ;;  %182 = vmatpush.msra.mxu3 %v161_v12  ;;  %237 = vmatpush.msrb.mxu0 %v193_v30 }
  0x13   :  { %331 = vmatmul.msk.f32.vlgmr.msra.gmra.mxu0 %vm63_vm2, %v56_v6  ;;  %155 = vmatpush.msra.mxu2 %v129_v13  ;;  %v194_v33 = vld [vmem:[%s617_s11] sm:$0xff] }
  0x14   :  { %183 = vmatpush.msra.mxu3 %v160_v14  ;;  %212 = vmatpush.msrb.mxu1 %v195_v32  ;;  %v342_v34 = vld [vmem:[%s613_s7] ss:$0 sm:$0xff] }
  0x15   :  { %v343_v35 = vld [vmem:[%s615_s9] ss:$0 sm:$0xff]  ;;  %279 = vmatpush.msrb.mxu2 %v259_v46 }
  0x16   :  { %213 = vmatpush.msrb.mxu1 %v194_v33  ;;  %v57_v42 = vld [vmem:[%s608_s2] sm:$0xff] }
  0x17   :  { %336 = vmatmul.msk.f32.vlgmr.msrb.gmra.mxu1 %vm63_vm2, %v56_v6  ;;  %280 = vmatpush.msrb.mxu2 %v258_v47  ;;  %v256_v49 = vld [vmem:[%s619_s13] sm:$0xff]  ;;  %s408_s13 = smov [#allocation2]  }
  0x18   :  { %v344_v51 = vld [vmem:[%s618_s12] ss:$0 sm:$0xff]  ;;  %s302_s5 = sshll.u32 %s408_s13, 4  ;;  %s303_s5 = int_to_ptr.vmem [resolvable:$true] %s302_s5 }
  0x19   :  { %281 = vmatpush.msrb.mxu2 %v257_v48  ;;  %v345_v1 = vld [vmem:[%s620_s14] ss:$0 sm:$0xff] }
  0x1b   :  { %282 = vmatpush.msrb.mxu2 %v256_v49 }
  0x88   :  { %v112_v15 = vpop.f32.mrf.mxu1 }
  0x90   :  { %v84_v17 = vpop.f32.mrf.mxu0 }
  0x91   :  { %v113_v18 = vadd.f32 %v112_v15, %v84_v17 }
  0x93   :  { %v119_v19 = vadd.f32 %v341_v16, %v113_v18 }
  0x94   :  { %v215_v50 = vpop.f32.mrf.mxu1 }
  0x95   :  { %v120_v20 = vand.u32 2147483647, %v119_v19  ;;  %v127_v26 = vmax.f32 %v119_v19, 0.0 }
  0x97   :  { %v121_v21 = vsub.f32 0.0, %v120_v20 }
  0x99   :  { %v122_v22 = vmul.f32 1.442695, %v121_v21 }
  0x9b   :  { %346 = vpow2.f32 %v122_v22 }
  0xa1   :  { %v347_v23 = vpop.eup %346 }
  0xa2   :  { %v124_v24 = vadd.f32 1.0, %v347_v23 }
  0xa4   :  { %348 = vlog2.f32 %v124_v24 }
  0xaa   :  { %v349_v25 = vpop.eup %348 }
  0xab   :  { %v126_v27 = vmul.f32 0.6931472, %v349_v25 }
  0xad   :  { %v128_v28 = vadd.f32 %v127_v26, %v126_v27 }
  0xaf   :  { %334 = vmatmul.msk.f32.vlgmr.msra.gmra.mxu2 %vm63_vm2, %v128_v28  ;;  %335 = vmatmul.msk.f32.vlgmr.msra.gmra.mxu3 %vm63_vm2, %v128_v28 }
 0x132   :  { %v157_v36 = vpop.f32.mrf.mxu2  ;;  %v185_v37 = vpop.f32.mrf.mxu3 }
 0x133   :  { %v158_v38 = vadd.f32 %v342_v34, %v157_v36  ;;  %v186_v39 = vadd.f32 %v343_v35, %v185_v37 }
 0x135   :  { %v188_v40 = vmul.f32 0.5, %v186_v39  ;;  %294 = vst.msk [vmem:[#allocation4] sm:$0xff] %vm218_vm3, %v186_v39 }
 0x136   :  { %293 = vst.msk [vmem:[#allocation2] sm:$0xff] %vm218_vm3, %v158_v38  ;;  %318 = dma.vmem_to_hbm [thread:$0]  %s314_s27, 128, %s316_s29, [#allocation5]  }
 0x137   :  { %v189_v41 = vmul.f32 1.442695, %v188_v40  ;;  %307 = dma.vmem_to_hbm [thread:$0]  %s303_s5, 128, %s305_s25, [#allocation3]  }
 0x139   :  { %350 = vpow2.f32 %v189_v41 }
 0x13f   :  { %v351_v43 = vpop.eup %350 }
 0x140   :  { %v191_v44 = vmul.f32 %v351_v43, %v57_v42 }
 0x142   :  { %v192_v45 = vadd.f32 %v191_v44, %v158_v38 }
 0x144   :  { %337 = vmatmul.msk.f32.vlgmr.msrb.gmra.mxu0 %vm218_vm3, %v192_v45 }
 0x1c1   :  { %v239_v52 = vpop.f32.mrf.mxu0 }
 0x1c2   :  { %v240_v53 = vadd.f32 %v239_v52, %v215_v50 }
 0x1c4   :  { %v246_v54 = vadd.f32 %v344_v51, %v240_v53 }
 0x1c6   :  { %v247_v55 = vand.u32 2147483647, %v246_v54  ;;  %v254_v62 = vmax.f32 %v246_v54, 0.0 }
 0x1c8   :  { %v248_v56 = vsub.f32 0.0, %v247_v55 }
 0x1ca   :  { %v249_v57 = vmul.f32 1.442695, %v248_v56 }
 0x1cc   :  { %352 = vpow2.f32 %v249_v57 }
 0x1d2   :  { %v353_v58 = vpop.eup %352 }
 0x1d3   :  { %v251_v59 = vadd.f32 1.0, %v353_v58 }
 0x1d5   :  { %354 = vlog2.f32 %v251_v59 }
 0x1db   :  { %v355_v60 = vpop.eup %354 }
 0x1dc   :  { %v253_v61 = vmul.f32 0.6931472, %v355_v60 }
 0x1de   :  { %v255_v63 = vadd.f32 %v254_v62, %v253_v61 }
 0x1e0   :  { %338 = vmatmul.msk.f32.vlgmr.msrb.gmra.mxu2 %vm63_vm2, %v255_v63 }
 0x263   :  { %v284_v3 = vpop.f32.mrf.mxu2 }
 0x264   :  { %v285_v4 = vadd.f32 %v345_v1, %v284_v3 }
 0x266   :  { %v290_v5 = vmax.f32 %v285_v4, 0.0 }
 0x268   :  { %v291_v6 = vsel %vm289_vm4, %v290_v5, %v285_v4 }
 0x269   :  { %292 = vst.msk [vmem:[%s621_s15] sm:$0xff] %vm87_vm1, %v291_v6 }
 0x26a   :  { %404 = dma.done.wait [#allocation3], 128  }
 0x26b   :  { %405 = vsyncadd [#allocation3], 4294967168 }
 0x26c   :  { %406 = dma.done.wait [#allocation5], 128  }
 0x26d   :  { %407 = vsyncadd [#allocation5], 4294967168 }
 0x26e   :  { %329 = vsyncpa [#allocation3], 1 }
 0x26f   :  { %330 = vsyncpa [#allocation5], 1 }

</bundles_post_ra>
